<compile_context>
chip_gen: v5e
topology: v5e:2x2
jax: 0.10.0
libtpu: 0.0.40
codegen_flags: <defaults>
</compile_context>

<pallas_src>
import functools
import math

import jax
import jax.numpy as jnp
from jax.experimental import pallas as pl
from jax.experimental.pallas import tpu as pltpu


def _round_up(x: int, m: int) -> int:
    return ((x + m - 1) // m) * m


def _apply_activation(y, activation):
    a = activation.lower() if isinstance(activation, str) else "none"
    if a == "none":
        return y
    if a == "relu":
        return jnp.maximum(y, 0.0)
    if a == "sigmoid":
        return jax.nn.sigmoid(y)          # EUP path; f32 accumulator
    if a == "tanh":
        return jnp.tanh(y)
    if a == "leakyrelu":
        return jnp.where(y >= 0, y, 0.01 * y)   # nn.LeakyReLU default slope
    raise NotImplementedError(f"activation {activation} not implemented")


def _mlp_stack_kernel(*refs, n_layers: int, activation: str):
    # refs = (x_ref, w0, b0, w1, b1, ..., o_ref); one batch tile per grid step.
    x_ref = refs[0]
    o_ref = refs[-1]
    wb = refs[1:-1]
    mm_dtype = wb[0].dtype                 # matmul input dtype (f32 or bf16)
    h = x_ref[...].astype(mm_dtype)        # single cast; stays in vregs/VMEM
    for l in range(n_layers):              # static unroll: layer count is static
        w = wb[2 * l][...]
        b = wb[2 * l + 1][...]
        y = jnp.dot(h, w, preferred_element_type=jnp.float32)   # MXU, f32 acc
        y = y + b.astype(jnp.float32)      # bias + activation on f32 accumulator
        y = _apply_activation(y, activation)
        h = y.astype(mm_dtype) if l + 1 < n_layers else y
    o_ref[...] = h.astype(o_ref.dtype)


@functools.partial(jax.jit, static_argnames=("activation",))
def mlp_forward_fused(x, padded_params, activation):
    """Run the whole padded MLP stack in a single Pallas kernel.

    x: [B, Din] (unpadded).  padded_params: list of (w_pad [DinP, DoutP],
    b_pad [1, DoutP]) with feature dims padded to multiples of 128.
    Returns the padded output [B_pad, DoutP_last]; the caller slices.
    """
    B, din = x.shape
    n_layers = len(padded_params)
    d0_pad = padded_params[0][0].shape[0]
    dlast_pad = padded_params[-1][0].shape[1]

    # Batch tiling: multiple of 8 sublanes, capped at 256 rows per tile.
    tm = min(256, _round_up(B, 8))
    b_pad = _round_up(B, tm)

    x_p = x
    if (b_pad, d0_pad) != (B, din):
        x_p = jnp.zeros((b_pad, d0_pad), x.dtype).at[:B, :din].set(x)

    grid = (b_pad // tm,)

    in_specs = [pl.BlockSpec((tm, d0_pad), lambda i: (i, 0))]
    operands = [x_p]
    for w_p, b_p in padded_params:
        din_p, dout_p = w_p.shape
        # Constant index_map: weights stay VMEM-resident across batch tiles
        # (no re-DMA when the block index does not change).
        in_specs.append(pl.BlockSpec((din_p, dout_p), lambda i: (0, 0)))
        in_specs.append(pl.BlockSpec((1, dout_p), lambda i: (0, 0)))
        operands += [w_p, b_p]

    out_spec = pl.BlockSpec((tm, dlast_pad), lambda i: (i, 0))
    out_shape = jax.ShapeDtypeStruct((b_pad, dlast_pad), x.dtype)

    # Advisory cost estimate so XLA schedules surrounding ops sensibly.
    isz = lambda a: a.dtype.itemsize
    flops = sum(2 * b_pad * w.shape[0] * w.shape[1] for w, _ in padded_params)
    bytes_accessed = x_p.size * isz(x_p) + b_pad * dlast_pad * isz(x_p)
    bytes_accessed += sum(w.size * isz(w) + b.size * isz(b)
                          for w, b in padded_params)
    transcendentals = 0
    if isinstance(activation, str) and activation.lower() in ("sigmoid", "tanh"):
        transcendentals = sum(b_pad * w.shape[1] for w, _ in padded_params)
    cost = pl.CostEstimate(flops=flops, transcendentals=transcendentals,
                           bytes_accessed=bytes_accessed)

    # VMEM budget: double-buffered x/out tiles + resident weights/biases +
    # f32 intermediates, with headroom; clamp to v7x's 64 MiB physical VMEM.
    max_w = max(max(w.shape) for w, _ in padded_params)
    vmem_needed = 2 * tm * (d0_pad + dlast_pad) * isz(x_p)
    vmem_needed += 2 * sum(w.size * isz(w) + b.size * isz(b)
                           for w, b in padded_params)
    vmem_needed += 4 * tm * max_w * 4
    vmem_limit = int(min(max(int(vmem_needed * 1.25), 32 * 1024 * 1024),
                         64 * 1024 * 1024))

    kernel = functools.partial(_mlp_stack_kernel, n_layers=n_layers,
                               activation=activation)
    return pl.pallas_call(
        kernel,
        out_shape=out_shape,
        grid=grid,
        in_specs=in_specs,
        out_specs=out_spec,
        compiler_params=pltpu.CompilerParams(
            dimension_semantics=("parallel",),  # megacore sharding on v7x
            vmem_limit_bytes=vmem_limit,
        ),
        cost_estimate=cost,
    )(*operands)


class MLPLayersPallas:
    """JAX/Pallas port of MLPLayers(layers, dropout, activation, bn=False).

    Inference semantics: Dropout(p) is identity; BatchNorm is not supported.
    matmul_dtype=jnp.bfloat16 stores weights in bf16 and uses the MXU bf16
    path with f32 accumulation (recommended on v6e/v7x).
    """

    def __init__(self, layers, dropout=0.0, activation="relu", bn=False,
                 seed=0, matmul_dtype=None):
        assert not bn, "BatchNorm1d not implemented in this Pallas port"
        # TODO(synk): training-mode dropout (p>0) not implemented (inference identity).
        self.layers = list(layers)
        self.activation = activation
        self.matmul_dtype = matmul_dtype
        self.params = []          # unpadded f32 (reference / export)
        self.padded_params = []   # lane-dense padded, kernel-ready
        key = jax.random.PRNGKey(seed)
        for din, dout in zip(self.layers[:-1], self.layers[1:]):
            key, kw, kb = jax.random.split(key, 3)
            # PyTorch nn.Linear default init: U(-1/sqrt(din), 1/sqrt(din)).
            bound = 1.0 / math.sqrt(din)
            w = jax.random.uniform(kw, (din, dout), jnp.float32, -bound, bound)
            b = jax.random.uniform(kb, (dout,), jnp.float32, -bound, bound)
            self.params.append((w, b))
            din_p, dout_p = _round_up(din, 128), _round_up(dout, 128)
            w_c = w if matmul_dtype is None else w.astype(matmul_dtype)
            w_p = jnp.zeros((din_p, dout_p), w_c.dtype).at[:din, :dout].set(w_c)
            b_p = jnp.zeros((1, dout_p), jnp.float32).at[0, :dout].set(b)
            self.padded_params.append((w_p, b_p))

    def __call__(self, x):
        B = x.shape[0]
        y_pad = mlp_forward_fused(x, self.padded_params, self.activation)
        return y_pad[:B, :self.layers[-1]]


if __name__ == "__main__":
    # Small, MLP-shaped example: batch=8, layers [32 -> 64 -> 16].
    layers = [32, 64, 16]
    batch = 8

    key = jax.random.PRNGKey(0)
    x = jax.random.normal(key, (batch, layers[0]), dtype=jnp.float32)

    # --- f32 path, ReLU: exact check against plain-JAX reference ---
    mlp = MLPLayersPallas(layers, dropout=0.0, activation="relu", bn=False, seed=0)
    out = jax.block_until_ready(mlp(x))
    ref = x
    for w, b in mlp.params:
        ref = jnp.maximum(ref @ w + b, 0.0)
    assert out.shape == (batch, layers[-1])
    assert jnp.allclose(out, ref, atol=1e-5, rtol=1e-5), "f32 relu mismatch"

    # --- activation='none' (module default) ---
    mlp_none = MLPLayersPallas(layers, activation="none", seed=1)
    out_n = jax.block_until_ready(mlp_none(x))
    ref_n = x
    for w, b in mlp_none.params:
        ref_n = ref_n @ w + b
    assert jnp.allclose(out_n, ref_n, atol=1e-5, rtol=1e-5), "none mismatch"

    # --- bf16 matmul path (f32 accumulation), dtype-matched reference ---
    mlp_bf = MLPLayersPallas(layers, activation="relu", seed=0,
                             matmul_dtype=jnp.bfloat16)
    out_bf = jax.block_until_ready(mlp_bf(x))
    ref_bf = x
    for w, b in mlp_bf.params:
        ref_bf = jnp.maximum(
            jnp.dot(ref_bf.astype(jnp.bfloat16), w.astype(jnp.bfloat16),
                    preferred_element_type=jnp.float32) + b, 0.0)
        ref_bf = ref_bf.astype(jnp.float32)
    assert jnp.allclose(out_bf, ref_bf, atol=2e-2, rtol=2e-2), "bf16 mismatch"

    print("KERNEL_OK")
</pallas_src>

<mosaic_0001>
module attributes {stable_mosaic.version = 11 : i64} {
  func.func @_mlp_stack_kernel(%arg0: i32, %arg1: memref<8x128xf32, #tpu.memory_space<vmem>>, %arg2: memref<128x128xf32, #tpu.memory_space<vmem>>, %arg3: memref<1x128xf32, #tpu.memory_space<vmem>>, %arg4: memref<128x128xf32, #tpu.memory_space<vmem>>, %arg5: memref<1x128xf32, #tpu.memory_space<vmem>>, %arg6: memref<8x128xf32, #tpu.memory_space<vmem>>) attributes {dimension_semantics = [#tpu.dimension_semantics<parallel>], iteration_bounds = array<i64: 1>, scalar_prefetch = 0 : i64, scratch_operands = 0 : i64, tpu.core_type = #tpu.core_type<tc>, window_params = [{transform_indices = @transform_0, window_bounds = array<i64: 8, 128>}, {pipeline_mode = #tpu.pipeline_mode<synchronous>, transform_indices = @transform_1, window_bounds = array<i64: 128, 128>}, {pipeline_mode = #tpu.pipeline_mode<synchronous>, transform_indices = @transform_2, window_bounds = array<i64: 1, 128>}, {pipeline_mode = #tpu.pipeline_mode<synchronous>, transform_indices = @transform_3, window_bounds = array<i64: 128, 128>}, {pipeline_mode = #tpu.pipeline_mode<synchronous>, transform_indices = @transform_4, window_bounds = array<i64: 1, 128>}, {transform_indices = @transform_5, window_bounds = array<i64: 8, 128>}]} {
    %c0 = arith.constant 0 : index
    %c0_0 = arith.constant 0 : index
    %0 = vector.load %arg1[%c0, %c0_0] : memref<8x128xf32, #tpu.memory_space<vmem>>, vector<8x128xf32>
    %c0_1 = arith.constant 0 : index
    %c0_2 = arith.constant 0 : index
    %1 = vector.load %arg2[%c0_1, %c0_2] : memref<128x128xf32, #tpu.memory_space<vmem>>, vector<128x128xf32>
    %c0_3 = arith.constant 0 : index
    %c0_4 = arith.constant 0 : index
    %2 = vector.load %arg3[%c0_3, %c0_4] : memref<1x128xf32, #tpu.memory_space<vmem>>, vector<1x128xf32>
    %cst = arith.constant dense<0.000000e+00> : vector<8x128xf32>
    %3 = tpu.matmul %0, %1, %cst {dimension_numbers = #tpu.dot_dimension_numbers<[1], [0], [0], [1], [0, 0, 1, 1], [], []>} : vector<8x128xf32>, vector<128x128xf32>, vector<8x128xf32> -> vector<8x128xf32>
    %4 = vector.broadcast %2 : vector<1x128xf32> to vector<8x128xf32>
    %5 = arith.addf %3, %4 : vector<8x128xf32>
    %cst_5 = arith.constant 0.000000e+00 : f32
    %6 = vector.broadcast %cst_5 : f32 to vector<8x128xf32>
    %7 = arith.maximumf %5, %6 : vector<8x128xf32>
    %c0_6 = arith.constant 0 : index
    %c0_7 = arith.constant 0 : index
    %8 = vector.load %arg4[%c0_6, %c0_7] : memref<128x128xf32, #tpu.memory_space<vmem>>, vector<128x128xf32>
    %c0_8 = arith.constant 0 : index
    %c0_9 = arith.constant 0 : index
    %9 = vector.load %arg5[%c0_8, %c0_9] : memref<1x128xf32, #tpu.memory_space<vmem>>, vector<1x128xf32>
    %cst_10 = arith.constant dense<0.000000e+00> : vector<8x128xf32>
    %10 = tpu.matmul %7, %8, %cst_10 {dimension_numbers = #tpu.dot_dimension_numbers<[1], [0], [0], [1], [0, 0, 1, 1], [], []>} : vector<8x128xf32>, vector<128x128xf32>, vector<8x128xf32> -> vector<8x128xf32>
    %11 = vector.broadcast %9 : vector<1x128xf32> to vector<8x128xf32>
    %12 = arith.addf %10, %11 : vector<8x128xf32>
    %cst_11 = arith.constant 0.000000e+00 : f32
    %13 = vector.broadcast %cst_11 : f32 to vector<8x128xf32>
    %14 = arith.maximumf %12, %13 : vector<8x128xf32>
    %c0_12 = arith.constant 0 : index
    %c0_13 = arith.constant 0 : index
    %15 = vector.load %arg6[%c0_12, %c0_13] : memref<8x128xf32, #tpu.memory_space<vmem>>, vector<8x128xf32>
    tpu.vector_store %arg6[%c0_12, %c0_13], %14 {strides = array<i32>} : memref<8x128xf32, #tpu.memory_space<vmem>>, vector<8x128xf32>,
    return
  }
  func.func @transform_0(%arg0: i32) -> (i32, i32) {
    %c0_i32 = arith.constant 0 : i32
    %c0_i32_0 = arith.constant 0 : i32
    return %arg0, %c0_i32 : i32, i32
  }
  func.func @transform_1(%arg0: i32) -> (i32, i32) {
    %c0_i32 = arith.constant 0 : i32
    %c0_i32_0 = arith.constant 0 : i32
    %c0_i32_1 = arith.constant 0 : i32
    return %c0_i32, %c0_i32_0 : i32, i32
  }
  func.func @transform_2(%arg0: i32) -> (i32, i32) {
    %c0_i32 = arith.constant 0 : i32
    %c0_i32_0 = arith.constant 0 : i32
    %c0_i32_1 = arith.constant 0 : i32
    return %c0_i32, %c0_i32_0 : i32, i32
  }
  func.func @transform_3(%arg0: i32) -> (i32, i32) {
    %c0_i32 = arith.constant 0 : i32
    %c0_i32_0 = arith.constant 0 : i32
    %c0_i32_1 = arith.constant 0 : i32
    return %c0_i32, %c0_i32_0 : i32, i32
  }
  func.func @transform_4(%arg0: i32) -> (i32, i32) {
    %c0_i32 = arith.constant 0 : i32
    %c0_i32_0 = arith.constant 0 : i32
    %c0_i32_1 = arith.constant 0 : i32
    return %c0_i32, %c0_i32_0 : i32, i32
  }
  func.func @transform_5(%arg0: i32) -> (i32, i32) {
    %c0_i32 = arith.constant 0 : i32
    %c0_i32_0 = arith.constant 0 : i32
    return %arg0, %c0_i32 : i32, i32
  }
}

</mosaic_0001>

<bundles_post_ra>
// kernel: mlp_forward_fused.1
= control target key start
LH: loop header
LB: loop body
LE: loop exit
PB: predicated region body
PF: predicated region fallthrough
CT: control target
= control target key end

     0   :  { %10 = vsyncpa [#allocation3], 0  ;;  %s293_s0 = inlined_call_operand.vmem [shape: f32[8,128], index: 0, kind: input, shape index: {}]   ;;  %s294_s1 = inlined_call_operand.hbm [shape: f32[128,128], index: 1, kind: input, shape index: {}]   ;;  %s295_s2 = inlined_call_operand.vmem [shape: f32[1,128], index: 2, kind: input, shape index: {}]   ;;  %s296_s3 = inlined_call_operand.hbm [shape: f32[128,128], index: 3, kind: input, shape index: {}]   ;;  %s297_s4 = inlined_call_operand.vmem [shape: f32[1,128], index: 4, kind: input, shape index: {}]   ;;  %s298_s5 = inlined_call_operand.hbm [shape: f32[8,128], index: 5, kind: output, shape index: {}]  }
   0x1   :  { %11 = vsyncpa [#allocation6], 0 }
   0x2   :  { %12 = vsyncpa [#allocation4], 0  ;;  %s19_s20 = sshll.u32 %s294_s1, 4  ;;  %s240_s21 = smov [#allocation2]   ;;  %s20_s20 = int_to_ptr.hbm [resolvable:$true] %s19_s20 }
   0x3   :  { %s21_s22 = sshll.u32 %s240_s21, 4  ;;  %s34_s25 = sshll.u32 %s296_s3, 4  ;;  %s22_s22 = int_to_ptr.vmem [resolvable:$true] %s21_s22  ;;  %s35_s25 = int_to_ptr.hbm [resolvable:$true] %s34_s25 }
   0x4   :  { %s241_s26 = smov 128   ;;  %s242_s27 = smov 8  }
   0x5   :  { %27 = dma.hbm_to_vmem [thread:$0]  %s20_s20, 2048, %s22_s22, [#allocation3], %s241_s26, %s241_s26, %s242_s27  }
   0x6   :  { %s243_s28 = smov [#allocation5]  }
   0x7   :  { %s36_s29 = sshll.u32 %s243_s28, 4  ;;  %s37_s29 = int_to_ptr.vmem [resolvable:$true] %s36_s29 }
   0x8   :  { %42 = dma.hbm_to_vmem [thread:$0]  %s35_s25, 2048, %s37_s29, [#allocation6], %s241_s26, %s241_s26, %s242_s27  }
   0x9   :  { %234 = dma.done.wait [#allocation3], 2048  }
   0xa   :  { %235 = vsyncadd [#allocation3], 4294965248 }
   0xb   :  { %236 = dma.done.wait [#allocation6], 2048  }
   0xc   :  { %237 = vsyncadd [#allocation6], 4294965248  ;;  %v69_v0 = vld [vmem:[#allocation2 + $0x78] sm:$0xff]  ;;  %v68_v1 = vld [vmem:[#allocation2 + $0x70] sm:$0xff]  ;;  %s144_s12 = sshll.u32 %s298_s5, 4  ;;  %s145_s12 = int_to_ptr.hbm [resolvable:$true] %s144_s12 }
   0xd   :  { %74 = vmatpush.msra.mxu0 %v69_v0  ;;  %v67_v2 = vld [vmem:[#allocation2 + $0x68] sm:$0xff]  ;;  %v66_v3 = vld [vmem:[#allocation2 + $0x60] sm:$0xff]  ;;  %v110_v4 = vld [vmem:[#allocation5 + $0x78] sm:$0xff] }
   0xe   :  { %v65_v5 = vld [vmem:[#allocation2 + $0x58] sm:$0xff]  ;;  %115 = vmatpush.msra.mxu1 %v110_v4  ;;  %v109_v6 = vld [vmem:[#allocation5 + $0x70] sm:$0xff]  ;;  %v108_v7 = vld [vmem:[#allocation5 + $0x68] sm:$0xff] }
   0xf   :  { %75 = vmatpush.msra.mxu0 %v68_v1  ;;  %v64_v8 = vld [vmem:[#allocation2 + $0x50] sm:$0xff]  ;;  %v107_v9 = vld [vmem:[#allocation5 + $0x60] sm:$0xff]  ;;  %v63_v10 = vld [vmem:[#allocation2 + $0x48] sm:$0xff] }
  0x10   :  { %116 = vmatpush.msra.mxu1 %v109_v6  ;;  %v106_v11 = vld [vmem:[#allocation5 + $0x58] sm:$0xff]  ;;  %v62_v12 = vld [vmem:[#allocation2 + $0x40] sm:$0xff]  ;;  %v105_v13 = vld [vmem:[#allocation5 + $0x50] sm:$0xff] }
  0x11   :  { %76 = vmatpush.msra.mxu0 %v67_v2  ;;  %v61_v14 = vld [vmem:[#allocation2 + $0x38] sm:$0xff]  ;;  %v104_v15 = vld [vmem:[#allocation5 + $0x48] sm:$0xff]  ;;  %v60_v16 = vld [vmem:[#allocation2 + $0x30] sm:$0xff] }
  0x12   :  { %117 = vmatpush.msra.mxu1 %v108_v7  ;;  %v103_v17 = vld [vmem:[#allocation5 + $0x40] sm:$0xff]  ;;  %v59_v18 = vld [vmem:[#allocation2 + $0x28] sm:$0xff]  ;;  %v102_v19 = vld [vmem:[#allocation5 + $0x38] sm:$0xff] }
  0x13   :  { %77 = vmatpush.msra.mxu0 %v66_v3  ;;  %v58_v20 = vld [vmem:[#allocation2 + $0x20] sm:$0xff]  ;;  %v101_v21 = vld [vmem:[#allocation5 + $0x30] sm:$0xff]  ;;  %v57_v22 = vld [vmem:[#allocation2 + $0x18] sm:$0xff] }
  0x14   :  { %118 = vmatpush.msra.mxu1 %v107_v9  ;;  %v100_v23 = vld [vmem:[#allocation5 + $0x28] sm:$0xff]  ;;  %v56_v24 = vld [vmem:[#allocation2 + $0x10] sm:$0xff]  ;;  %v99_v25 = vld [vmem:[#allocation5 + $0x20] sm:$0xff] }
  0x15   :  { %78 = vmatpush.msra.mxu0 %v65_v5  ;;  %v55_v26 = vld [vmem:[#allocation2 + $0x8] sm:$0xff]  ;;  %v98_v27 = vld [vmem:[#allocation5 + $0x18] sm:$0xff]  ;;  %v54_v28 = vld [vmem:[#allocation2] sm:$0xff] }
  0x16   :  { %119 = vmatpush.msra.mxu1 %v106_v11  ;;  %v53_v29 = vld [vmem:[%s293_s0] sm:$0xff]  ;;  %v97_v30 = vld [vmem:[#allocation5 + $0x10] sm:$0xff]  ;;  %v96_v31 = vld [vmem:[#allocation5 + $0x8] sm:$0xff]  ;;  %s244_s0 = smov [#allocation7]  }
  0x17   :  { %79 = vmatpush.msra.mxu0 %v64_v8  ;;  %v95_v32 = vld [vmem:[#allocation5] sm:$0xff]  ;;  %s142_s9 = sshll.u32 %s244_s0, 4  ;;  %s143_s9 = int_to_ptr.vmem [resolvable:$true] %s142_s9 }
  0x18   :  { %120 = vmatpush.msra.mxu1 %v105_v13  ;;  %v160_v33 = vld [vmem:[%s295_s2] ss:$0 sm:$0xff] }
  0x19   :  { %80 = vmatpush.msra.mxu0 %v63_v10  ;;  %v161_v37 = vld [vmem:[%s297_s4] ss:$0 sm:$0xff] }
  0x1a   :  { %121 = vmatpush.msra.mxu1 %v104_v15 }
  0x1b   :  { %81 = vmatpush.msra.mxu0 %v62_v12 }
  0x1c   :  { %122 = vmatpush.msra.mxu1 %v103_v17 }
  0x1d   :  { %82 = vmatpush.msra.mxu0 %v61_v14 }
  0x1e   :  { %123 = vmatpush.msra.mxu1 %v102_v19 }
  0x1f   :  { %83 = vmatpush.msra.mxu0 %v60_v16 }
  0x20   :  { %124 = vmatpush.msra.mxu1 %v101_v21 }
  0x21   :  { %84 = vmatpush.msra.mxu0 %v59_v18 }
  0x22   :  { %125 = vmatpush.msra.mxu1 %v100_v23 }
  0x23   :  { %85 = vmatpush.msra.mxu0 %v58_v20 }
  0x24   :  { %126 = vmatpush.msra.mxu1 %v99_v25 }
  0x25   :  { %86 = vmatpush.msra.mxu0 %v57_v22 }
  0x26   :  { %127 = vmatpush.msra.mxu1 %v98_v27 }
  0x27   :  { %87 = vmatpush.msra.mxu0 %v56_v24 }
  0x28   :  { %128 = vmatpush.msra.mxu1 %v97_v30 }
  0x29   :  { %88 = vmatpush.msra.mxu0 %v55_v26 }
  0x2a   :  { %129 = vmatpush.msra.mxu1 %v96_v31 }
  0x2b   :  { %89 = vmatpush.msra.mxu0 %v54_v28 }
  0x2c   :  { %90 = vmatmul.f32.vlgmr.msra.gmra.mxu0 %v53_v29  ;;  %130 = vmatpush.msra.mxu1 %v95_v32 }
  0xa9   :  { %v91_v34 = vpop.f32.mrf.mxu0 }
  0xaa   :  { %v92_v35 = vadd.f32 %v160_v33, %v91_v34 }
  0xac   :  { %v94_v36 = vmax.f32 %v92_v35, 0.0 }
  0xae   :  { %131 = vmatmul.f32.vlgmr.msra.gmra.mxu1 %v94_v36 }
 0x12b   :  { %v132_v38 = vpop.f32.mrf.mxu1 }
 0x12c   :  { %v133_v39 = vadd.f32 %v161_v37, %v132_v38 }
 0x12e   :  { %v135_v40 = vmax.f32 %v133_v39, 0.0 }
 0x130   :  { %136 = vst [vmem:[#allocation7] sm:$0xff] %v135_v40 }
 0x131   :  { %147 = dma.vmem_to_hbm [thread:$0]  %s143_s9, 128, %s145_s12, [#allocation4]  }
 0x132   :  { %238 = dma.done.wait [#allocation4], 128  }
 0x133   :  { %239 = vsyncadd [#allocation4], 4294967168 }
 0x134   :  { %152 = vsyncpa [#allocation3], 1 }
 0x135   :  { %153 = vsyncpa [#allocation6], 1 }
 0x136   :  { %154 = vsyncpa [#allocation4], 1 }

</bundles_post_ra>
